<compile_context>
chip_gen: v5e
topology: v5e:2x2
jax: 0.10.0
libtpu: 0.0.40
codegen_flags: <defaults>
</compile_context>

<pallas_src>
import jax
import jax.numpy as jnp
from jax.experimental import pallas as pl
from jax.experimental.pallas import tpu as pltpu


def _round_up(x, m):
    return ((x + m - 1) // m) * m


def _plausibility_kernel(x_ref, w_ref, b_ref, o_ref):
    """One batch tile of Linear(D, 1):  o = sum(x * w, -1) + b.

    x_ref: [TB, D] VMEM, input dtype (ragged last tile: extra rows are garbage
           but their outputs are masked on writeback; no cross-row dependency)
    w_ref: [1,  D] VMEM, input dtype (same block every step -> stays resident)
    b_ref: [1,  1] SMEM f32
    o_ref: [TB, 1] VMEM, input dtype
    """
    x = x_ref[...]
    w = w_ref[...]                       # [1, D] sublane-broadcast over rows (VPU)
    prod = x * w                         # multiply in input dtype (bf16 VALU on v6e/v7x)
    acc = jnp.sum(prod, axis=-1, keepdims=True, dtype=jnp.float32)  # f32 accumulation
    o_ref[...] = (acc + b_ref[0, 0]).astype(o_ref.dtype)


def plausibility_scores(cls_vectors, weight, bias, *, block_rows=2048):
    """Pallas equivalent of self.plausibility_head(cls_vectors).squeeze(-1).

    Args:
      cls_vectors: [B, D] float32 or bfloat16
      weight:      [1, D] float32   (torch.nn.Linear weight layout)
      bias:        [1]    float32
    Returns:
      scores: [B] in cls_vectors.dtype
    """
    B, D = cls_vectors.shape
    x = cls_vectors
    itemsize = jnp.dtype(x.dtype).itemsize

    # Double-buffered activation budget ~24 MiB keeps 2*TB*D*itemsize (plus the
    # tiny weight/output) under the 32 MiB scoped-VMEM limit set below on all
    # generations (v5e default scoped is only 16 MiB, so the explicit limit
    # matters there).
    vmem_budget = 24 * 1024 * 1024
    max_rows = max(8, ((vmem_budget // (2 * D * itemsize)) // 8) * 8)
    TB = min(block_rows, max_rows, _round_up(B, 8))
    TB = max(8, (TB // 8) * 8)
    # Guarantee >= 2 grid steps when the batch allows it, so the "parallel"
    # batch axis can be sharded across both TensorCores on v7x.
    while TB > 128 and pl.cdiv(B, TB) < 2:
        TB = max(128, _round_up(TB // 2, 8))

    grid = (pl.cdiv(B, TB),)

    # Tiny one-time casts outside the kernel; weight matches x's dtype so the
    # in-kernel multiply runs on the native VPU path for bf16 inputs.
    w = weight.astype(x.dtype)                 # [1, D], resident across the grid
    b = bias.reshape(1, 1).astype(jnp.float32)

    out = pl.pallas_call(
        _plausibility_kernel,
        out_shape=jax.ShapeDtypeStruct((B, 1), x.dtype),
        grid=grid,
        in_specs=[
            # x tile: pipelined; last dim is the full array dim (no padding),
            # ragged last batch tile is masked by Pallas.
            pl.BlockSpec((TB, D), lambda i: (i, 0)),
            # weight: same block every step -> stays resident in VMEM.
            pl.BlockSpec((1, D), lambda i: (0, 0)),
            # bias scalar in SMEM.
            pl.BlockSpec(memory_space=pltpu.MemorySpace.SMEM),
        ],
        out_specs=pl.BlockSpec((TB, 1), lambda i: (i, 0)),
        compiler_params=pltpu.CompilerParams(
            dimension_semantics=("parallel",),   # megacore-shard batch on v7x
            vmem_limit_bytes=32 * 1024 * 1024,
        ),
    )(x, w, b)

    return out[:, 0]   # squeeze(-1); already in the input dtype


class BERTTripleScorerPallas:
    """Deterministic, in-script parameter init mirroring the PyTorch module."""

    def __init__(self, hidden_size, key):
        self.hidden_size = hidden_size
        k_cls, k_comp, k_w, k_b = jax.random.split(key, 4)
        # nn.Parameter(torch.randn(1, 1, hidden_size))
        self.cls_embedding = jax.random.normal(k_cls, (1, 1, hidden_size), jnp.float32)
        # nn.Parameter(torch.randn(hidden_size))
        self.compound_embedding = jax.random.normal(k_comp, (hidden_size,), jnp.float32)
        # nn.Linear(hidden_size, 1): weight [1, D], bias [1] (uniform(+-1/sqrt(D)))
        bound = 1.0 / (hidden_size ** 0.5)
        self.head_weight = jax.random.uniform(
            k_w, (1, hidden_size), jnp.float32, -bound, bound
        )
        self.head_bias = jax.random.uniform(k_b, (1,), jnp.float32, -bound, bound)

    def __call__(self, cls_vectors, **kwargs):
        return plausibility_scores(cls_vectors, self.head_weight, self.head_bias, **kwargs)


if __name__ == "__main__":
    hidden_size = 32
    batch = 8

    key = jax.random.PRNGKey(0)
    k_params, k_x, k_x2 = jax.random.split(key, 3)

    model = BERTTripleScorerPallas(hidden_size, k_params)

    # --- small demo shape consistent with the module's forward() ---
    cls_vectors = jax.random.normal(k_x, (batch, hidden_size), jnp.float32)
    scores = model(cls_vectors)
    jax.block_until_ready(scores)

    ref = (cls_vectors @ model.head_weight.T + model.head_bias)[:, 0]
    assert scores.shape == (batch,)
    assert scores.dtype == cls_vectors.dtype
    assert jnp.allclose(scores, ref, atol=1e-5, rtol=1e-5)

    # --- multi-tile grid + ragged (masked) last tile, D not multiple of 128 ---
    B2, D2 = 300, 96
    model2 = BERTTripleScorerPallas(D2, k_params)
    x2 = jax.random.normal(k_x2, (B2, D2), jnp.float32)
    scores2 = model2(x2, block_rows=128)   # grid of 3 batch tiles, last one ragged
    jax.block_until_ready(scores2)
    ref2 = (x2 @ model2.head_weight.T + model2.head_bias)[:, 0]
    assert scores2.shape == (B2,)
    assert jnp.allclose(scores2, ref2, atol=1e-5, rtol=1e-5)

    # --- bf16 path: multiply in bf16, accumulate in f32, bf16 output ---
    scores2_bf16 = model2(x2.astype(jnp.bfloat16))
    jax.block_until_ready(scores2_bf16)
    assert scores2_bf16.dtype == jnp.bfloat16
    assert jnp.allclose(scores2_bf16.astype(jnp.float32), ref2, atol=5e-2, rtol=5e-2)

    print("KERNEL_OK")
</pallas_src>

<mosaic_0001>
module attributes {stable_mosaic.version = 11 : i64} {
  func.func @_plausibility_kernel(%arg0: i32, %arg1: memref<8x32xf32, #tpu.memory_space<vmem>>, %arg2: memref<1x32xf32, #tpu.memory_space<vmem>>, %arg3: memref<1x1xf32, #tpu.memory_space<smem>>, %arg4: memref<8x1xf32, #tpu.memory_space<vmem>>) attributes {dimension_semantics = [#tpu.dimension_semantics<parallel>], iteration_bounds = array<i64: 1>, scalar_prefetch = 0 : i64, scratch_operands = 0 : i64, tpu.core_type = #tpu.core_type<tc>, window_params = [{transform_indices = @transform_0, window_bounds = array<i64: 8, 32>}, {pipeline_mode = #tpu.pipeline_mode<synchronous>, transform_indices = @transform_1, window_bounds = array<i64: 1, 32>}, {transform_indices = @transform_2, window_bounds = array<i64: 1, 1>}, {transform_indices = @transform_3, window_bounds = array<i64: 8, 1>}]} {
    %c0 = arith.constant 0 : index
    %c0_0 = arith.constant 0 : index
    %0 = vector.load %arg1[%c0, %c0_0] : memref<8x32xf32, #tpu.memory_space<vmem>>, vector<8x32xf32>
    %c0_1 = arith.constant 0 : index
    %c0_2 = arith.constant 0 : index
    %1 = vector.load %arg2[%c0_1, %c0_2] : memref<1x32xf32, #tpu.memory_space<vmem>>, vector<1x32xf32>
    %2 = vector.broadcast %1 : vector<1x32xf32> to vector<8x32xf32>
    %3 = arith.mulf %0, %2 : vector<8x32xf32>
    %cst = arith.constant dense<0.000000e+00> : vector<8xf32>
    %4 = vector.multi_reduction <add>, %3, %cst [1] : vector<8x32xf32> to vector<8xf32>
    %5 = vector.shape_cast %4 : vector<8xf32> to vector<8x1xf32>
    %c0_3 = arith.constant 0 : index
    %c0_4 = arith.constant 0 : index
    %6 = memref.load %arg3[%c0_3, %c0_4] : memref<1x1xf32, #tpu.memory_space<smem>>
    %7 = vector.broadcast %6 : f32 to vector<8x1xf32>
    %8 = arith.addf %5, %7 : vector<8x1xf32>
    %c0_5 = arith.constant 0 : index
    %c0_6 = arith.constant 0 : index
    %9 = vector.load %arg4[%c0_5, %c0_6] : memref<8x1xf32, #tpu.memory_space<vmem>>, vector<8x1xf32>
    tpu.vector_store %arg4[%c0_5, %c0_6], %8 {strides = array<i32>} : memref<8x1xf32, #tpu.memory_space<vmem>>, vector<8x1xf32>,
    return
  }
  func.func @transform_0(%arg0: i32) -> (i32, i32) {
    %c0_i32 = arith.constant 0 : i32
    %c0_i32_0 = arith.constant 0 : i32
    return %arg0, %c0_i32 : i32, i32
  }
  func.func @transform_1(%arg0: i32) -> (i32, i32) {
    %c0_i32 = arith.constant 0 : i32
    %c0_i32_0 = arith.constant 0 : i32
    %c0_i32_1 = arith.constant 0 : i32
    return %c0_i32, %c0_i32_0 : i32, i32
  }
  func.func @transform_2(%arg0: i32) -> (i32, i32) {
    %c0_i32 = arith.constant 0 : i32
    %c0_i32_0 = arith.constant 0 : i32
    %c0_i32_1 = arith.constant 0 : i32
    return %c0_i32, %c0_i32_0 : i32, i32
  }
  func.func @transform_3(%arg0: i32) -> (i32, i32) {
    %c0_i32 = arith.constant 0 : i32
    %c0_i32_0 = arith.constant 0 : i32
    return %arg0, %c0_i32 : i32, i32
  }
}

</mosaic_0001>

<bundles_post_ra>
// kernel: tpu_custom_call.1
= control target key start
LH: loop header
LB: loop body
LE: loop exit
PB: predicated region body
PF: predicated region fallthrough
CT: control target
= control target key end

     0   :  { %9 = vsyncpa [#allocation4], 0  ;;  %s77_s15 = smov [#allocation3]   ;;  %s110_s0 = inlined_call_operand.hbm [shape: f32[8,32], index: 0, kind: input, shape index: {}]   ;;  %s111_s1 = inlined_call_operand.vmem [shape: f32[1,32], index: 1, kind: input, shape index: {}]   ;;  %s112_s2 = inlined_call_operand.<no memory space> [shape: f32[1,1], index: 2, kind: input, shape index: {}]   ;;  %s113_s3 = inlined_call_operand.vmem [shape: f32[8,1], index: 3, kind: output, shape index: {}]  }
   0x1   :  { %s15_s14 = sshll.u32 %s110_s0, 4  ;;  %s17_s16 = sshll.u32 %s77_s15, 4  ;;  %s16_s14 = int_to_ptr.hbm [resolvable:$true] %s15_s14  ;;  %s18_s16 = int_to_ptr.vmem [resolvable:$true] %s17_s16 }
   0x2   :  { %20 = dma.hbm_to_vmem [thread:$0]  %s16_s14, 128, %s18_s16, [#allocation4]  }
   0x3   :  { %75 = dma.done.wait [#allocation4], 128  }
   0x4   :  { %76 = vsyncadd [#allocation4], 4294967168  ;;  %v29_v0 = vld [vmem:[#allocation3] sm:$0xff]  ;;  %vm35_vm0 = vcmask 261120   ;;  %v40_v4 = vstv %s112_s2  ;;  %vm42_vm1 = vcmask 7168  }
   0x5   :  { %v50_v1 = vld [vmem:[%s111_s1] ss:$0 sm:$0xff] }
   0x6   :  { %v34_v2 = vmul.f32 %v50_v1, %v29_v0 }
   0x8   :  { %v36_v3 = vsel %vm35_vm0, %v34_v2, 0.0 }
   0x9   :  { %37 = vadd.xlane.f32.xlu0 %v36_v3 }
  0x7c   :  { %v38_v5 = vpop.xlane.xlu0 %37 }
  0x7d   :  { %v41_v6 = vadd.f32 %v40_v4, %v38_v5 }
  0x7f   :  { %43 = vst.msk [vmem:[%s113_s3] sm:$0xff] %vm42_vm1, %v41_v6 }
  0x80   :  { %48 = vsyncpa [#allocation4], 1 }

</bundles_post_ra>
